<compile_context>
chip_gen: v5e
topology: v5e:2x2
jax: 0.10.0
libtpu: 0.0.40
codegen_flags: <defaults>
</compile_context>

<pallas_src>
import math

import jax
import jax.numpy as jnp
from jax.experimental import pallas as pl
from jax.experimental.pallas import tpu as pltpu

_NEG = -1e30
_LN_EPS = 1e-12  # matches nn.LayerNorm(d_model, eps=1e-12) in the source


def _layernorm(x, gamma, beta, eps=_LN_EPS):
    mean = jnp.mean(x, axis=-1, keepdims=True)
    var = jnp.mean((x - mean) ** 2, axis=-1, keepdims=True)
    return (x - mean) * jax.lax.rsqrt(var + eps) * gamma + beta


def _const_spec(shape):
    zeros = (0,) * len(shape)
    return pl.BlockSpec(shape, lambda *_: zeros)


def _pick_tile(n, max_tile, candidates=(512, 256, 128, 64, 32, 16, 8)):
    for t in candidates:
        if t <= max_tile and t <= n and n % t == 0:
            return t
    return n  # block == full dim is always legal (may be VMEM-heavy for odd large dims)


def _vmem_limit_bytes():
    # ~3/4 of physical VMEM per core, capped: ~48 MiB on v7x, ~96 MiB on v5e/v6e.
    try:
        cap = int(pltpu.get_tpu_info().vmem_capacity_bytes)
    except Exception:
        cap = 128 * 1024 * 1024
    return int(min(cap * 3 // 4, 100 * 1024 * 1024))


# ---------------------------------------------------------------------------
# Pass 1: LN1 + Q/K/V projection (once per token), head-major bf16 outputs
# ---------------------------------------------------------------------------
def _ln_qkv_proj_kernel(x_ref, g1_ref, be1_ref, wq_ref, wk_ref, wv_ref,
                        bq_ref, bk_ref, bv_ref,
                        xln_ref, q_ref, k_ref, v_ref):
    T, _ = x_ref.shape[1], x_ref.shape[2]
    H, hd = q_ref.shape[1], q_ref.shape[3]
    cdt = wq_ref.dtype
    scale = 1.0 / math.sqrt(hd)

    x_ln = _layernorm(x_ref[0].astype(jnp.float32), g1_ref[...], be1_ref[...])
    xln_ref[0] = x_ln                                    # f32 residual for pass 3
    x_c = x_ln.astype(cdt)

    q = (jnp.dot(x_c, wq_ref[...], preferred_element_type=jnp.float32)
         + bq_ref[...]) * scale
    k = jnp.dot(x_c, wk_ref[...], preferred_element_type=jnp.float32) + bk_ref[...]
    v = jnp.dot(x_c, wv_ref[...], preferred_element_type=jnp.float32) + bv_ref[...]

    # head-major (H, T, hd) so the flash loop never transposes per step
    q_ref[0] = jnp.transpose(q.reshape(T, H, hd), (1, 0, 2)).astype(cdt)
    k_ref[0] = jnp.transpose(k.reshape(T, H, hd), (1, 0, 2)).astype(cdt)
    v_ref[0] = jnp.transpose(v.reshape(T, H, hd), (1, 0, 2)).astype(cdt)


# ---------------------------------------------------------------------------
# Pass 2: causal flash attention over precomputed head-major q/k/v
# ---------------------------------------------------------------------------
def _flash_attention_kernel(q_ref, k_ref, v_ref, o_ref, m_sc, l_sc, acc_sc):
    H, Tq, hd = q_ref.shape[1], q_ref.shape[2], q_ref.shape[3]
    Tk = k_ref.shape[2]
    D = H * hd
    cdt = q_ref.dtype

    qi = pl.program_id(1)
    ki = pl.program_id(2)
    nk = pl.num_programs(2)

    @pl.when(ki == 0)
    def _init():
        m_sc[...] = jnp.full(m_sc.shape, _NEG, jnp.float32)
        l_sc[...] = jnp.zeros(l_sc.shape, jnp.float32)
        acc_sc[...] = jnp.zeros(acc_sc.shape, jnp.float32)

    row0 = qi * Tq
    col0 = ki * Tk
    is_valid = col0 < row0 + Tq                    # tile has >=1 allowed column
    is_full = (col0 + Tk - 1) <= row0              # every (row, col) allowed -> no mask
    is_diag = jnp.logical_and(is_valid, jnp.logical_not(is_full))

    def _score():
        return jnp.einsum("hqd,hkd->hqk", q_ref[0], k_ref[0],
                          preferred_element_type=jnp.float32)

    def _update(s):
        m_prev = m_sc[...]
        m_new = jnp.maximum(m_prev, jnp.max(s, axis=-1, keepdims=True))
        alpha = jnp.exp(m_prev - m_new)
        p = jnp.exp(s - m_new)
        l_sc[...] = alpha * l_sc[...] + jnp.sum(p, axis=-1, keepdims=True)
        acc_sc[...] = alpha * acc_sc[...] + jnp.einsum(
            "hqk,hkd->hqd", p.astype(cdt), v_ref[0],
            preferred_element_type=jnp.float32)
        m_sc[...] = m_new

    @pl.when(is_full)                              # strictly below diagonal: no mask work
    def _below_diag():
        _update(_score())

    @pl.when(is_diag)                              # diagonal-straddling tile: mask
    def _on_diag():
        s = _score()
        rowg = row0 + jax.lax.broadcasted_iota(jnp.int32, (Tq, Tk), 0)
        colg = col0 + jax.lax.broadcasted_iota(jnp.int32, (Tq, Tk), 1)
        s = jnp.where((colg > rowg)[None, :, :], jnp.float32(_NEG), s)
        _update(s)

    @pl.when(ki == nk - 1)
    def _finalize():
        inv_l = pl.reciprocal(l_sc[...], approx=True)
        ctx = acc_sc[...] * inv_l                                  # (H, Tq, hd) f32
        o_ref[0] = jnp.transpose(ctx, (1, 0, 2)).reshape(Tq, D).astype(o_ref.dtype)


# ---------------------------------------------------------------------------
# Pass 3: out_proj + residual + LN2 + FFN (tiled over F) + residual
# ---------------------------------------------------------------------------
def _out_proj_ffn_kernel(ctx_ref, xln_ref, wo_ref, bo_ref, g2_ref, be2_ref,
                         w1_ref, b1_ref, w2_ref, b2_ref, o_ref,
                         x2_sc, x2c_sc, acc_sc):
    nf = pl.program_id(1)
    n_f = pl.num_programs(1)
    cdt = wo_ref.dtype

    @pl.when(nf == 0)
    def _init():
        attn = jnp.dot(ctx_ref[...], wo_ref[...],
                       preferred_element_type=jnp.float32) + bo_ref[...]
        x1 = attn + xln_ref[...]                    # residual is post-LN1 x (source semantics)
        x2 = _layernorm(x1, g2_ref[...], be2_ref[...])
        x2_sc[...] = x2
        x2c_sc[...] = x2.astype(cdt)
        acc_sc[...] = jnp.zeros(acc_sc.shape, jnp.float32)

    h = jnp.maximum(
        jnp.dot(x2c_sc[...], w1_ref[...], preferred_element_type=jnp.float32)
        + b1_ref[...], 0.0)
    acc_sc[...] += jnp.dot(h.astype(cdt), w2_ref[...],
                           preferred_element_type=jnp.float32)

    @pl.when(nf == n_f - 1)
    def _finalize():
        # residual is post-LN2 x (source semantics)
        o_ref[...] = (acc_sc[...] + b2_ref[...] + x2_sc[...]).astype(o_ref.dtype)


# ---------------------------------------------------------------------------
# Wrapper
# ---------------------------------------------------------------------------
def transformer_layer(x, params, *, num_heads, compute_dtype=jnp.bfloat16,
                      q_tile=256, kv_tile=128, row_tile=256, ffn_tile=1024):
    """x: (B, S, D) float32.  params: PyTorch-layout weights (see make_params)."""
    B, S, D = x.shape
    F = params["w1"].shape[0]
    H = num_heads
    assert D % H == 0, "d_model must be divisible by num_heads"
    hd = D // H
    cdt = compute_dtype
    vmem_limit = _vmem_limit_bytes()

    # --- layout plumbing outside the kernels: split + pre-transpose + bf16 cast ---
    w_in = params["w_in"]                                    # (3D, D)
    wq_t = w_in[0 * D:1 * D].T.astype(cdt)                   # (D, D)
    wk_t = w_in[1 * D:2 * D].T.astype(cdt)
    wv_t = w_in[2 * D:3 * D].T.astype(cdt)
    b_in = params["b_in"].reshape(3, D).astype(jnp.float32)
    bq, bk, bv = b_in[0:1], b_in[1:2], b_in[2:3]             # (1, D) each
    wo_t = params["w_out"].T.astype(cdt)                     # (D, D)
    bo = params["b_out"].reshape(1, D).astype(jnp.float32)
    g1 = params["ln1_g"].reshape(1, D).astype(jnp.float32)
    be1 = params["ln1_b"].reshape(1, D).astype(jnp.float32)
    g2 = params["ln2_g"].reshape(1, D).astype(jnp.float32)
    be2 = params["ln2_b"].reshape(1, D).astype(jnp.float32)
    w1_t = params["w1"].T.astype(cdt)                        # (D, F)
    b1 = params["b1"].reshape(1, F).astype(jnp.float32)
    w2_t = params["w2"].T.astype(cdt)                        # (F, D)
    b2 = params["b2"].reshape(1, D).astype(jnp.float32)

    # ---------------- Pass 1: LN1 + Q/K/V projection ----------------
    T1 = _pick_tile(S, q_tile)
    cost1 = pl.CostEstimate(
        flops=int(6 * B * S * D * D),
        transcendentals=int(B * S),
        bytes_accessed=int(8 * B * S * D + 6 * B * S * D + 6 * D * D),
    )
    xln, qh, kh, vh = pl.pallas_call(
        _ln_qkv_proj_kernel,
        out_shape=(
            jax.ShapeDtypeStruct((B, S, D), jnp.float32),
            jax.ShapeDtypeStruct((B, H, S, hd), cdt),
            jax.ShapeDtypeStruct((B, H, S, hd), cdt),
            jax.ShapeDtypeStruct((B, H, S, hd), cdt),
        ),
        grid_spec=pltpu.PrefetchScalarGridSpec(
            num_scalar_prefetch=0,
            grid=(B, S // T1),
            in_specs=[
                pl.BlockSpec((1, T1, D), lambda b, si: (b, si, 0)),
                _const_spec((1, D)), _const_spec((1, D)),                # ln1 g/b
                _const_spec((D, D)), _const_spec((D, D)), _const_spec((D, D)),
                _const_spec((1, D)), _const_spec((1, D)), _const_spec((1, D)),
            ],
            out_specs=(
                pl.BlockSpec((1, T1, D), lambda b, si: (b, si, 0)),
                pl.BlockSpec((1, H, T1, hd), lambda b, si: (b, 0, si, 0)),
                pl.BlockSpec((1, H, T1, hd), lambda b, si: (b, 0, si, 0)),
                pl.BlockSpec((1, H, T1, hd), lambda b, si: (b, 0, si, 0)),
            ),
        ),
        compiler_params=pltpu.CompilerParams(
            dimension_semantics=("parallel", "parallel"),
            vmem_limit_bytes=vmem_limit,
        ),
        cost_estimate=cost1,
    )(x, g1, be1, wq_t, wk_t, wv_t, bq, bk, bv)

    # ---------------- Pass 2: causal flash attention ----------------
    Tq = _pick_tile(S, q_tile)
    Tk = _pick_tile(S, kv_tile)
    NQ, NK = S // Tq, S // Tk

    def kv_index(b, qi, ki):
        # clamp to the last kv block this q-tile actually needs -> DMA elided for
        # causally-skipped (above-diagonal) steps.
        kmax = ((qi + 1) * Tq - 1) // Tk
        return (b, 0, jnp.minimum(ki, kmax), 0)

    cost2 = pl.CostEstimate(
        flops=int(2 * B * S * S * D),                       # QK^T + PV, causal ~1/2
        transcendentals=int(B * H * S * S // 2),
        bytes_accessed=int(2 * B * S * D * (2 + 2 * max(1, (NQ + 1) // 2))),
    )
    ctx = pl.pallas_call(
        _flash_attention_kernel,
        out_shape=jax.ShapeDtypeStruct((B, S, D), cdt),
        grid_spec=pltpu.PrefetchScalarGridSpec(
            num_scalar_prefetch=0,
            grid=(B, NQ, NK),
            in_specs=[
                pl.BlockSpec((1, H, Tq, hd), lambda b, qi, ki: (b, 0, qi, 0)),
                pl.BlockSpec((1, H, Tk, hd), kv_index),
                pl.BlockSpec((1, H, Tk, hd), kv_index),
            ],
            out_specs=pl.BlockSpec((1, Tq, D), lambda b, qi, ki: (b, qi, 0)),
            scratch_shapes=[
                pltpu.VMEM((H, Tq, 1), jnp.float32),   # running max
                pltpu.VMEM((H, Tq, 1), jnp.float32),   # running sum
                pltpu.VMEM((H, Tq, hd), jnp.float32),  # context accumulator
            ],
        ),
        compiler_params=pltpu.CompilerParams(
            dimension_semantics=("parallel", "parallel", "arbitrary"),
            vmem_limit_bytes=vmem_limit,
        ),
        cost_estimate=cost2,
    )(qh, kh, vh)

    # ---------------- Pass 3: out_proj + LN2 + FFN (tiled over F) ----------------
    R = B * S
    Tr = _pick_tile(R, row_tile)
    Tf = _pick_tile(F, ffn_tile, candidates=(2048, 1024, 512, 256, 128))
    NF = F // Tf
    ctx2d = ctx.reshape(R, D)
    xln2d = xln.reshape(R, D)

    cost3 = pl.CostEstimate(
        flops=int(B * S * (2 * D * D + 4 * D * F)),
        transcendentals=int(B * S),
        bytes_accessed=int(10 * B * S * D + 2 * (D * D + 2 * D * F) * (R // Tr)),
    )
    out2d = pl.pallas_call(
        _out_proj_ffn_kernel,
        out_shape=jax.ShapeDtypeStruct((R, D), x.dtype),
        grid_spec=pltpu.PrefetchScalarGridSpec(
            num_scalar_prefetch=0,
            grid=(R // Tr, NF),
            in_specs=[
                pl.BlockSpec((Tr, D), lambda ri, nf: (ri, 0)),   # ctx
                pl.BlockSpec((Tr, D), lambda ri, nf: (ri, 0)),   # xln (residual)
                _const_spec((D, D)), _const_spec((1, D)),        # wo_t, bo
                _const_spec((1, D)), _const_spec((1, D)),        # ln2 g/b
                pl.BlockSpec((D, Tf), lambda ri, nf: (0, nf)),   # w1_t slab
                pl.BlockSpec((1, Tf), lambda ri, nf: (0, nf)),   # b1 slab
                pl.BlockSpec((Tf, D), lambda ri, nf: (nf, 0)),   # w2_t slab
                _const_spec((1, D)),                             # b2
            ],
            out_specs=pl.BlockSpec((Tr, D), lambda ri, nf: (ri, 0)),
            scratch_shapes=[
                pltpu.VMEM((Tr, D), jnp.float32),   # x2 (f32 residual)
                pltpu.VMEM((Tr, D), cdt),           # x2 in compute dtype
                pltpu.VMEM((Tr, D), jnp.float32),   # FFN accumulator
            ],
        ),
        compiler_params=pltpu.CompilerParams(
            dimension_semantics=("parallel", "arbitrary"),
            vmem_limit_bytes=vmem_limit,
        ),
        cost_estimate=cost3,
    )(ctx2d, xln2d, wo_t, bo, g2, be2, w1_t, b1, w2_t, b2)

    return out2d.reshape(B, S, D)


# ---------------------------------------------------------------------------
# Pure-JAX f32 reference (mirrors the PyTorch forward) for tolerance checking
# ---------------------------------------------------------------------------
def transformer_layer_reference(x, params, *, num_heads):
    B, S, D = x.shape
    H = num_heads
    hd = D // H

    def ln(v, g, b, eps=_LN_EPS):
        m = jnp.mean(v, -1, keepdims=True)
        var = jnp.mean((v - m) ** 2, -1, keepdims=True)
        return (v - m) / jnp.sqrt(var + eps) * g + b

    x_ln = ln(x, params["ln1_g"], params["ln1_b"])
    qkv = x_ln @ params["w_in"].T + params["b_in"]
    q, k, v = jnp.split(qkv, 3, axis=-1)
    q = q.reshape(B, S, H, hd).transpose(0, 2, 1, 3) / jnp.sqrt(jnp.float32(hd))
    k = k.reshape(B, S, H, hd).transpose(0, 2, 1, 3)
    v = v.reshape(B, S, H, hd).transpose(0, 2, 1, 3)
    s = q @ k.transpose(0, 1, 3, 2)
    mask = jnp.triu(jnp.ones((S, S), bool), k=1)
    s = jnp.where(mask[None, None], -jnp.inf, s)
    p = jax.nn.softmax(s, axis=-1)
    ctx = (p @ v).transpose(0, 2, 1, 3).reshape(B, S, D)
    attn = ctx @ params["w_out"].T + params["b_out"]
    x1 = attn + x_ln
    x2 = ln(x1, params["ln2_g"], params["ln2_b"])
    h = jax.nn.relu(x2 @ params["w1"].T + params["b1"])
    f = h @ params["w2"].T + params["b2"]
    return f + x2


def make_params(key, d_model, ffn_hid_dim):
    ks = jax.random.split(key, 10)

    def rnd(k, shape, scale):
        return jax.random.normal(k, shape, jnp.float32) * scale

    return {
        "w_in":  rnd(ks[0], (3 * d_model, d_model), 0.05),
        "b_in":  rnd(ks[1], (3 * d_model,), 0.02),
        "w_out": rnd(ks[2], (d_model, d_model), 0.05),
        "b_out": rnd(ks[3], (d_model,), 0.02),
        "ln1_g": jnp.ones((d_model,), jnp.float32),
        "ln1_b": jnp.zeros((d_model,), jnp.float32),
        "ln2_g": jnp.ones((d_model,), jnp.float32),
        "ln2_b": jnp.zeros((d_model,), jnp.float32),
        "w1":    rnd(ks[4], (ffn_hid_dim, d_model), 0.05),
        "b1":    rnd(ks[5], (ffn_hid_dim,), 0.02),
        "w2":    rnd(ks[6], (d_model, ffn_hid_dim), 0.05),
        "b2":    rnd(ks[7], (d_model,), 0.02),
    }


if __name__ == "__main__":
    key = jax.random.PRNGKey(0)

    # ---- test 1: small config (single tile everywhere) ----
    B, S, D, H, F = 2, 8, 32, 4, 64
    kx, kp = jax.random.split(key)
    x = jax.random.normal(kx, (B, S, D), jnp.float32)
    params = make_params(kp, D, F)

    out = transformer_layer(x, params, num_heads=H)
    out = jax.block_until_ready(out)
    assert out.shape == (B, S, D)
    assert bool(jnp.all(jnp.isfinite(out)))
    ref = transformer_layer_reference(x, params, num_heads=H)
    max_err = float(jnp.max(jnp.abs(out - ref)))
    assert max_err < 5e-2, f"test1 max abs error {max_err} too large"

    # ---- test 2: longer sequence with forced multi-tile (Tq != Tk) causal path ----
    B2, S2, D2, H2, F2 = 2, 64, 32, 4, 64
    kx2, kp2 = jax.random.split(kp)
    x2 = jax.random.normal(kx2, (B2, S2, D2), jnp.float32)
    params2 = make_params(kp2, D2, F2)

    out2 = transformer_layer(x2, params2, num_heads=H2,
                             q_tile=32, kv_tile=16, row_tile=32)
    out2 = jax.block_until_ready(out2)
    assert out2.shape == (B2, S2, D2)
    assert bool(jnp.all(jnp.isfinite(out2)))
    ref2 = transformer_layer_reference(x2, params2, num_heads=H2)
    max_err2 = float(jnp.max(jnp.abs(out2 - ref2)))
    assert max_err2 < 5e-2, f"test2 max abs error {max_err2} too large"

    print("KERNEL_OK")
</pallas_src>

<mosaic_0001>
module attributes {stable_mosaic.version = 11 : i64} {
  func.func @_ln_qkv_proj_kernel(%arg0: i32, %arg1: i32, %arg2: memref<1x8x32xf32, #tpu.memory_space<vmem>>, %arg3: memref<1x32xf32, #tpu.memory_space<vmem>>, %arg4: memref<1x32xf32, #tpu.memory_space<vmem>>, %arg5: memref<32x32xbf16, #tpu.memory_space<vmem>>, %arg6: memref<32x32xbf16, #tpu.memory_space<vmem>>, %arg7: memref<32x32xbf16, #tpu.memory_space<vmem>>, %arg8: memref<1x32xf32, #tpu.memory_space<vmem>>, %arg9: memref<1x32xf32, #tpu.memory_space<vmem>>, %arg10: memref<1x32xf32, #tpu.memory_space<vmem>>, %arg11: memref<1x8x32xf32, #tpu.memory_space<vmem>>, %arg12: memref<1x4x8x8xbf16, #tpu.memory_space<vmem>>, %arg13: memref<1x4x8x8xbf16, #tpu.memory_space<vmem>>, %arg14: memref<1x4x8x8xbf16, #tpu.memory_space<vmem>>) attributes {dimension_semantics = [#tpu.dimension_semantics<parallel>, #tpu.dimension_semantics<parallel>], iteration_bounds = array<i64: 2, 1>, scalar_prefetch = 0 : i64, scratch_operands = 0 : i64, tpu.core_type = #tpu.core_type<tc>, window_params = [{transform_indices = @transform_0, window_bounds = array<i64: 1, 8, 32>}, {pipeline_mode = #tpu.pipeline_mode<synchronous>, transform_indices = @transform_1, window_bounds = array<i64: 1, 32>}, {pipeline_mode = #tpu.pipeline_mode<synchronous>, transform_indices = @transform_2, window_bounds = array<i64: 1, 32>}, {pipeline_mode = #tpu.pipeline_mode<synchronous>, transform_indices = @transform_3, window_bounds = array<i64: 32, 32>}, {pipeline_mode = #tpu.pipeline_mode<synchronous>, transform_indices = @transform_4, window_bounds = array<i64: 32, 32>}, {pipeline_mode = #tpu.pipeline_mode<synchronous>, transform_indices = @transform_5, window_bounds = array<i64: 32, 32>}, {pipeline_mode = #tpu.pipeline_mode<synchronous>, transform_indices = @transform_6, window_bounds = array<i64: 1, 32>}, {pipeline_mode = #tpu.pipeline_mode<synchronous>, transform_indices = @transform_7, window_bounds = array<i64: 1, 32>}, {pipeline_mode = #tpu.pipeline_mode<synchronous>, transform_indices = @transform_8, window_bounds = array<i64: 1, 32>}, {transform_indices = @transform_9, window_bounds = array<i64: 1, 8, 32>}, {transform_indices = @transform_10, window_bounds = array<i64: 1, 4, 8, 8>}, {transform_indices = @transform_11, window_bounds = array<i64: 1, 4, 8, 8>}, {transform_indices = @transform_12, window_bounds = array<i64: 1, 4, 8, 8>}]} {
    %c0 = arith.constant 0 : index
    %c0_0 = arith.constant 0 : index
    %c0_1 = arith.constant 0 : index
    %0 = vector.load %arg2[%c0, %c0_0, %c0_1] : memref<1x8x32xf32, #tpu.memory_space<vmem>>, vector<1x8x32xf32>
    %1 = vector.shape_cast %0 : vector<1x8x32xf32> to vector<8x32xf32>
    %c0_2 = arith.constant 0 : index
    %c0_3 = arith.constant 0 : index
    %2 = vector.load %arg3[%c0_2, %c0_3] : memref<1x32xf32, #tpu.memory_space<vmem>>, vector<1x32xf32>
    %c0_4 = arith.constant 0 : index
    %c0_5 = arith.constant 0 : index
    %3 = vector.load %arg4[%c0_4, %c0_5] : memref<1x32xf32, #tpu.memory_space<vmem>>, vector<1x32xf32>
    %cst = arith.constant dense<0.000000e+00> : vector<8xf32>
    %4 = vector.multi_reduction <add>, %1, %cst [1] : vector<8x32xf32> to vector<8xf32>
    %5 = vector.shape_cast %4 : vector<8xf32> to vector<8x1xf32>
    %cst_6 = arith.constant 3.200000e+01 : f32
    %6 = vector.broadcast %cst_6 : f32 to vector<8x1xf32>
    %7 = arith.divf %5, %6 : vector<8x1xf32>
    %8 = vector.broadcast %7 : vector<8x1xf32> to vector<8x32xf32>
    %9 = arith.subf %1, %8 : vector<8x32xf32>
    %10 = arith.mulf %9, %9 : vector<8x32xf32>
    %cst_7 = arith.constant dense<0.000000e+00> : vector<8xf32>
    %11 = vector.multi_reduction <add>, %10, %cst_7 [1] : vector<8x32xf32> to vector<8xf32>
    %12 = vector.shape_cast %11 : vector<8xf32> to vector<8x1xf32>
    %cst_8 = arith.constant 3.200000e+01 : f32
    %13 = vector.broadcast %cst_8 : f32 to vector<8x1xf32>
    %14 = arith.divf %12, %13 : vector<8x1xf32>
    %15 = vector.broadcast %7 : vector<8x1xf32> to vector<8x32xf32>
    %16 = arith.subf %1, %15 : vector<8x32xf32>
    %cst_9 = arith.constant 9.99999996E-13 : f32
    %17 = vector.broadcast %cst_9 : f32 to vector<8x1xf32>
    %18 = arith.addf %14, %17 : vector<8x1xf32>
    %19 = math.rsqrt %18 : vector<8x1xf32>
    %20 = vector.broadcast %19 : vector<8x1xf32> to vector<8x32xf32>
    %21 = arith.mulf %16, %20 : vector<8x32xf32>
    %22 = vector.broadcast %2 : vector<1x32xf32> to vector<8x32xf32>
    %23 = arith.mulf %21, %22 : vector<8x32xf32>
    %24 = vector.broadcast %3 : vector<1x32xf32> to vector<8x32xf32>
    %25 = arith.addf %23, %24 : vector<8x32xf32>
    %c0_10 = arith.constant 0 : index
    %c0_11 = arith.constant 0 : index
    %c0_12 = arith.constant 0 : index
    %26 = vector.load %arg11[%c0_10, %c0_11, %c0_12] : memref<1x8x32xf32, #tpu.memory_space<vmem>>, vector<1x8x32xf32>
    %27 = vector.shape_cast %26 : vector<1x8x32xf32> to vector<8x32xf32>
    %28 = vector.shape_cast %25 : vector<8x32xf32> to vector<1x8x32xf32>
    tpu.vector_store %arg11[%c0_10, %c0_11, %c0_12], %28 {strides = array<i32>} : memref<1x8x32xf32, #tpu.memory_space<vmem>>, vector<1x8x32xf32>,
    %29 = arith.truncf %25 : vector<8x32xf32> to vector<8x32xbf16>
    %c0_13 = arith.constant 0 : index
    %c0_14 = arith.constant 0 : index
    %30 = vector.load %arg5[%c0_13, %c0_14] : memref<32x32xbf16, #tpu.memory_space<vmem>>, vector<32x32xbf16>
    %cst_15 = arith.constant dense<0.000000e+00> : vector<8x32xf32>
    %31 = tpu.matmul %29, %30, %cst_15 {dimension_numbers = #tpu.dot_dimension_numbers<[1], [0], [0], [1], [0, 0, 1, 1], [], []>} : vector<8x32xbf16>, vector<32x32xbf16>, vector<8x32xf32> -> vector<8x32xf32>
    %c0_16 = arith.constant 0 : index
    %c0_17 = arith.constant 0 : index
    %32 = vector.load %arg8[%c0_16, %c0_17] : memref<1x32xf32, #tpu.memory_space<vmem>>, vector<1x32xf32>
    %33 = vector.broadcast %32 : vector<1x32xf32> to vector<8x32xf32>
    %34 = arith.addf %31, %33 : vector<8x32xf32>
    %cst_18 = arith.constant 0.353553385 : f32
    %35 = vector.broadcast %cst_18 : f32 to vector<8x32xf32>
    %36 = arith.mulf %34, %35 : vector<8x32xf32>
    %c0_19 = arith.constant 0 : index
    %c0_20 = arith.constant 0 : index
    %37 = vector.load %arg6[%c0_19, %c0_20] : memref<32x32xbf16, #tpu.memory_space<vmem>>, vector<32x32xbf16>
    %cst_21 = arith.constant dense<0.000000e+00> : vector<8x32xf32>
    %38 = tpu.matmul %29, %37, %cst_21 {dimension_numbers = #tpu.dot_dimension_numbers<[1], [0], [0], [1], [0, 0, 1, 1], [], []>} : vector<8x32xbf16>, vector<32x32xbf16>, vector<8x32xf32> -> vector<8x32xf32>
    %c0_22 = arith.constant 0 : index
    %c0_23 = arith.constant 0 : index
    %39 = vector.load %arg9[%c0_22, %c0_23] : memref<1x32xf32, #tpu.memory_space<vmem>>, vector<1x32xf32>
    %40 = vector.broadcast %39 : vector<1x32xf32> to vector<8x32xf32>
    %41 = arith.addf %38, %40 : vector<8x32xf32>
    %c0_24 = arith.constant 0 : index
    %c0_25 = arith.constant 0 : index
    %42 = vector.load %arg7[%c0_24, %c0_25] : memref<32x32xbf16, #tpu.memory_space<vmem>>, vector<32x32xbf16>
    %cst_26 = arith.constant dense<0.000000e+00> : vector<8x32xf32>
    %43 = tpu.matmul %29, %42, %cst_26 {dimension_numbers = #tpu.dot_dimension_numbers<[1], [0], [0], [1], [0, 0, 1, 1], [], []>} : vector<8x32xbf16>, vector<32x32xbf16>, vector<8x32xf32> -> vector<8x32xf32>
    %c0_27 = arith.constant 0 : index
    %c0_28 = arith.constant 0 : index
    %44 = vector.load %arg10[%c0_27, %c0_28] : memref<1x32xf32, #tpu.memory_space<vmem>>, vector<1x32xf32>
    %45 = vector.broadcast %44 : vector<1x32xf32> to vector<8x32xf32>
    %46 = arith.addf %43, %45 : vector<8x32xf32>
    %47 = vector.shape_cast %36 : vector<8x32xf32> to vector<8x4x8xf32>
    %48 = tpu.transpose %47, [1, 0, 2] : vector<8x4x8xf32> -> vector<4x8x8xf32>
    %49 = arith.truncf %48 : vector<4x8x8xf32> to vector<4x8x8xbf16>
    %c0_29 = arith.constant 0 : index
    %c0_30 = arith.constant 0 : index
    %c0_31 = arith.constant 0 : index
    %c0_32 = arith.constant 0 : index
    %50 = vector.load %arg12[%c0_29, %c0_30, %c0_31, %c0_32] : memref<1x4x8x8xbf16, #tpu.memory_space<vmem>>, vector<1x4x8x8xbf16>
    %51 = vector.shape_cast %50 : vector<1x4x8x8xbf16> to vector<4x8x8xbf16>
    %52 = vector.shape_cast %49 : vector<4x8x8xbf16> to vector<1x4x8x8xbf16>
    tpu.vector_store %arg12[%c0_29, %c0_30, %c0_31, %c0_32], %52 {strides = array<i32>} : memref<1x4x8x8xbf16, #tpu.memory_space<vmem>>, vector<1x4x8x8xbf16>,
    %53 = vector.shape_cast %41 : vector<8x32xf32> to vector<8x4x8xf32>
    %54 = tpu.transpose %53, [1, 0, 2] : vector<8x4x8xf32> -> vector<4x8x8xf32>
    %55 = arith.truncf %54 : vector<4x8x8xf32> to vector<4x8x8xbf16>
    %c0_33 = arith.constant 0 : index
    %c0_34 = arith.constant 0 : index
    %c0_35 = arith.constant 0 : index
    %c0_36 = arith.constant 0 : index
    %56 = vector.load %arg13[%c0_33, %c0_34, %c0_35, %c0_36] : memref<1x4x8x8xbf16, #tpu.memory_space<vmem>>, vector<1x4x8x8xbf16>
    %57 = vector.shape_cast %56 : vector<1x4x8x8xbf16> to vector<4x8x8xbf16>
    %58 = vector.shape_cast %55 : vector<4x8x8xbf16> to vector<1x4x8x8xbf16>
    tpu.vector_store %arg13[%c0_33, %c0_34, %c0_35, %c0_36], %58 {strides = array<i32>} : memref<1x4x8x8xbf16, #tpu.memory_space<vmem>>, vector<1x4x8x8xbf16>,
    %59 = vector.shape_cast %46 : vector<8x32xf32> to vector<8x4x8xf32>
    %60 = tpu.transpose %59, [1, 0, 2] : vector<8x4x8xf32> -> vector<4x8x8xf32>
    %61 = arith.truncf %60 : vector<4x8x8xf32> to vector<4x8x8xbf16>
    %c0_37 = arith.constant 0 : index
    %c0_38 = arith.constant 0 : index
    %c0_39 = arith.constant 0 : index
    %c0_40 = arith.constant 0 : index
    %62 = vector.load %arg14[%c0_37, %c0_38, %c0_39, %c0_40] : memref<1x4x8x8xbf16, #tpu.memory_space<vmem>>, vector<1x4x8x8xbf16>
    %63 = vector.shape_cast %62 : vector<1x4x8x8xbf16> to vector<4x8x8xbf16>
    %64 = vector.shape_cast %61 : vector<4x8x8xbf16> to vector<1x4x8x8xbf16>
    tpu.vector_store %arg14[%c0_37, %c0_38, %c0_39, %c0_40], %64 {strides = array<i32>} : memref<1x4x8x8xbf16, #tpu.memory_space<vmem>>, vector<1x4x8x8xbf16>,
    return
  }
  func.func @transform_0(%arg0: i32, %arg1: i32) -> (i32, i32, i32) {
    %c0_i32 = arith.constant 0 : i32
    %c0_i32_0 = arith.constant 0 : i32
    return %arg0, %arg1, %c0_i32 : i32, i32, i32
  }
  func.func @transform_1(%arg0: i32, %arg1: i32) -> (i32, i32) {
    %c0_i32 = arith.constant 0 : i32
    %c0_i32_0 = arith.constant 0 : i32
    %c0_i32_1 = arith.constant 0 : i32
    return %c0_i32, %c0_i32_0 : i32, i32
  }
  func.func @transform_2(%arg0: i32, %arg1: i32) -> (i32, i32) {
    %c0_i32 = arith.constant 0 : i32
    %c0_i32_0 = arith.constant 0 : i32
    %c0_i32_1 = arith.constant 0 : i32
    return %c0_i32, %c0_i32_0 : i32, i32
  }
  func.func @transform_3(%arg0: i32, %arg1: i32) -> (i32, i32) {
    %c0_i32 = arith.constant 0 : i32
    %c0_i32_0 = arith.constant 0 : i32
    %c0_i32_1 = arith.constant 0 : i32
    return %c0_i32, %c0_i32_0 : i32, i32
  }
  func.func @transform_4(%arg0: i32, %arg1: i32) -> (i32, i32) {
    %c0_i32 = arith.constant 0 : i32
    %c0_i32_0 = arith.constant 0 : i32
    %c0_i32_1 = arith.constant 0 : i32
    return %c0_i32, %c0_i32_0 : i32, i32
  }
  func.func @transform_5(%arg0: i32, %arg1: i32) -> (i32, i32) {
    %c0_i32 = arith.constant 0 : i32
    %c0_i32_0 = arith.constant 0 : i32
    %c0_i32_1 = arith.constant 0 : i32
    return %c0_i32, %c0_i32_0 : i32, i32
  }
  func.func @transform_6(%arg0: i32, %arg1: i32) -> (i32, i32) {
    %c0_i32 = arith.constant 0 : i32
    %c0_i32_0 = arith.constant 0 : i32
    %c0_i32_1 = arith.constant 0 : i32
    return %c0_i32, %c0_i32_0 : i32, i32
  }
  func.func @transform_7(%arg0: i32, %arg1: i32) -> (i32, i32) {
    %c0_i32 = arith.constant 0 : i32
    %c0_i32_0 = arith.constant 0 : i32
    %c0_i32_1 = arith.constant 0 : i32
    return %c0_i32, %c0_i32_0 : i32, i32
  }
  func.func @transform_8(%arg0: i32, %arg1: i32) -> (i32, i32) {
    %c0_i32 = arith.constant 0 : i32
    %c0_i32_0 = arith.constant 0 : i32
    %c0_i32_1 = arith.constant 0 : i32
    return %c0_i32, %c0_i32_0 : i32, i32
  }
  func.func @transform_9(%arg0: i32, %arg1: i32) -> (i32, i32, i32) {
    %c0_i32 = arith.constant 0 : i32
    %c0_i32_0 = arith.constant 0 : i32
    return %arg0, %arg1, %c0_i32 : i32, i32, i32
  }
  func.func @transform_10(%arg0: i32, %arg1: i32) -> (i32, i32, i32, i32) {
    %c0_i32 = arith.constant 0 : i32
    %c0_i32_0 = arith.constant 0 : i32
    %c0_i32_1 = arith.constant 0 : i32
    return %arg0, %c0_i32, %arg1, %c0_i32_0 : i32, i32, i32, i32
  }
  func.func @transform_11(%arg0: i32, %arg1: i32) -> (i32, i32, i32, i32) {
    %c0_i32 = arith.constant 0 : i32
    %c0_i32_0 = arith.constant 0 : i32
    %c0_i32_1 = arith.constant 0 : i32
    return %arg0, %c0_i32, %arg1, %c0_i32_0 : i32, i32, i32, i32
  }
  func.func @transform_12(%arg0: i32, %arg1: i32) -> (i32, i32, i32, i32) {
    %c0_i32 = arith.constant 0 : i32
    %c0_i32_0 = arith.constant 0 : i32
    %c0_i32_1 = arith.constant 0 : i32
    return %arg0, %c0_i32, %arg1, %c0_i32_0 : i32, i32, i32, i32
  }
}

</mosaic_0001>

<bundles_post_ra>
// kernel: tpu_custom_call.1
= control target key start
LH: loop header
LB: loop body
LE: loop exit
PB: predicated region body
PF: predicated region fallthrough
CT: control target
= control target key end

     0   :  { %s2485_s0 = inlined_call_operand.hbm [shape: f32[2,8,32], index: 0, kind: input, shape index: {}]   ;;  %s2486_s1 = inlined_call_operand.hbm [shape: f32[1,32], index: 1, kind: input, shape index: {}]   ;;  %s2487_s2 = inlined_call_operand.vmem [shape: f32[1,32], index: 2, kind: input, shape index: {}]   ;;  %s2488_s3 = inlined_call_operand.hbm [shape: bf16[32,32], index: 3, kind: input, shape index: {}]   ;;  %s2489_s4 = inlined_call_operand.hbm [shape: bf16[32,32], index: 4, kind: input, shape index: {}]   ;;  %s2490_s5 = inlined_call_operand.hbm [shape: bf16[32,32], index: 5, kind: input, shape index: {}]   ;;  %s2491_s6 = inlined_call_operand.vmem [shape: f32[1,32], index: 6, kind: input, shape index: {}]   ;;  %s2492_s7 = inlined_call_operand.vmem [shape: f32[1,32], index: 7, kind: input, shape index: {}]   ;;  %s2493_s8 = inlined_call_operand.vmem [shape: f32[1,32], index: 8, kind: input, shape index: {}]   ;;  %s2494_s9 = inlined_call_operand.hbm [shape: f32[2,8,32], index: 9, kind: output, shape index: {0}]   ;;  %s2495_s10 = inlined_call_operand.hbm [shape: bf16[2,4,8,8], index: 10, kind: output, shape index: {1}]   ;;  %s2496_s11 = inlined_call_operand.hbm [shape: bf16[2,4,8,8], index: 11, kind: output, shape index: {2}]   ;;  %s2497_s12 = inlined_call_operand.hbm [shape: bf16[2,4,8,8], index: 12, kind: output, shape index: {3}]  }
   0x1   :  { %2501 = sst [smem:[#allocation24_spill]] %s2485_s0 }
   0x2   :  { %2502 = sst [smem:[#allocation25_spill]] %s2486_s1 }
   0x3   :  { %2503 = sst [smem:[#allocation26_spill]] %s2487_s2 }
   0x4   :  { %2504 = sst [smem:[#allocation27_spill]] %s2488_s3 }
   0x5   :  { %2505 = sst [smem:[#allocation28_spill]] %s2489_s4 }
   0x6   :  { %2506 = sst [smem:[#allocation29_spill]] %s2490_s5 }
   0x7   :  { %2507 = sst [smem:[#allocation30_spill]] %s2491_s6 }
   0x8   :  { %2508 = sst [smem:[#allocation31_spill]] %s2497_s12 }
   0x9   :  { %18 = vsyncpa [#allocation3], 0 }
   0xa   :  { %20 = vsyncpa [#allocation3 + $0x1], 0 }
   0xb   :  { %21 = vsyncpa [#allocation6], 0 }
   0xc   :  { %22 = vsyncpa [#allocation9], 0 }
   0xd   :  { %23 = vsyncpa [#allocation4], 0 }
   0xe   :  { %25 = vsyncpa [#allocation4 + $0x1], 0 }
   0xf   :  { %26 = vsyncpa [#allocation13], 0 }
  0x10   :  { %28 = vsyncpa [#allocation13 + $0x1], 0 }
  0x11   :  { %29 = vsyncpa [#allocation16], 0 }
  0x12   :  { %31 = vsyncpa [#allocation16 + $0x1], 0  ;;  %s2019_s21 = smov 0   ;;  %s2021_s22 = smov 0  }
  0x13   :  { %s2023_s23 = smov 0   ;;  %s2025_s24 = smov 0  }
  0x14   :  { %s2027_s25 = smov 0   ;;  %s2029_s26 = smov 0  }
  0x15 LB: > { %s2050_s27 = sadd.s32 4294967295, %s1938_s26   ;;  %p1387_p0 = scmp.ge.s32.totalorder %s1938_s26, 1  ;;  %s1938_s26 = sphi %s2029_s26, %s37_s26   ;;  %s1934_s25 = sphi %s2027_s25, %s2529_s25   ;;  %s1930_s24 = sphi %s2025_s24, %s2528_s24   ;;  %s1926_s23 = sphi %s2023_s23, %s2527_s23   ;;  %s1922_s22 = sphi %s2021_s22, %s2526_s22   ;;  %s1918_s21 = sphi %s2019_s21, %s2525_s21  }
  0x16   : > { %p72_p1 = scmp.eq.s32.totalorder %s2050_s27, 0  ;;  %p362_p2 = scmp.lt.s32.totalorder %s1938_s26, 3 }
  0x17   : > { %s2509_s1 = sld [smem:[#allocation25_spill]]  ;;  %p1392_p4 = scmp.ge.s32.totalorder %s1938_s26, 2 }
  0x18   : > { %p2058_p3 = pnand %p1387_p0, %p362_p2  ;;  %s1940_s14 = smov [#allocation5]  }
  0x19   : > { %s376_s15 = sshll.u32 %s1940_s14, 4  ;;  %s2512_s4 = sld [smem:[#allocation28_spill]]  ;;  %s377_s15 = int_to_ptr.vmem [resolvable:$true] %s376_s15 }
  0x1a   : > { %p1480_p5 = pneg %p2058_p3  ;;  %s1941_s20 = smov [#allocation8]  }
  0x1b   : > { %s404_s28 = sshll.u32 %s1941_s20, 4  ;;  %s2513_s3 = sld [smem:[#allocation27_spill]]  ;;  %s405_s28 = int_to_ptr.vmem [resolvable:$true] %s404_s28 }
  0x1c   : > { %p2067_p6 = pnand %p1480_p5, %p72_p1  ;;  %s1942_s12 = smov 64  }
  0x1d   : > { %s374_s30 = sshll.u32 %s2509_s1, 4  ;;  %s1943_s17 = smov 4   ;;  %s375_s30 = int_to_ptr.hbm [resolvable:$true] %s374_s30 }
  0x1e   : > { %1483 = dma.hbm_to_vmem [thread:$0]  (!%p2067_p6), %s375_s30, 16, %s377_s15, [#allocation6]  }
  0x1f   : > { %s402_s19 = sshll.u32 %s2512_s4, 4  ;;  %s2514_s5 = sld [smem:[#allocation29_spill]]  ;;  %s403_s19 = int_to_ptr.hbm [resolvable:$true] %s402_s19 }
  0x20   : > { %1489 = dma.hbm_to_vmem [thread:$0]  (!%p2067_p6), %s403_s19, 256, %s405_s28, [#allocation9], %s1942_s12, %s1942_s12, %s1943_s17  }
  0x21   : > { %s388_s1 = sshll.u32 %s2513_s3, 4  ;;  %s1944_s20 = smov [#allocation7]   ;;  %s389_s1 = int_to_ptr.hbm [resolvable:$true] %s388_s1 }
  0x22   : > { %s390_s29 = sshll.u32 %s1944_s20, 4  ;;  %s1945_s14 = smov [#allocation10]   ;;  %s391_s29 = int_to_ptr.vmem [resolvable:$true] %s390_s29 }
  0x23   : > { %1486 = dma.hbm_to_vmem [thread:$0]  (!%p2067_p6), %s389_s1, 256, %s391_s29, [#allocation6], %s1942_s12, %s1942_s12, %s1943_s17  }
  0x24   : > { %s418_s3 = sshll.u32 %s1945_s14, 4  ;;  %s49_s19 = sadd.s32 1, %s1934_s25  ;;  %s419_s3 = int_to_ptr.vmem [resolvable:$true] %s418_s3 }
  0x25   : > { %s416_s15 = sshll.u32 %s2514_s5, 4  ;;  %s2500_s28 = sadd.s32 4294967294, %s1938_s26   ;;  %s417_s15 = int_to_ptr.hbm [resolvable:$true] %s416_s15 }
  0x26   : > { %1492 = dma.hbm_to_vmem [thread:$0]  (!%p2067_p6), %s417_s15, 256, %s419_s3, [#allocation9], %s1942_s12, %s1942_s12, %s1943_s17  }
  0x27   : > { %p51_p7 = scmp.ge.s32.totalorder %s49_s19, 2  ;;  %s58_s18 = sadd.s32 1, %s1926_s23 }
  0x28   : > { %p65_p8 = scmp.ne.s32.totalorder %s1926_s23, %s1922_s22  ;;  %p66_p9 = scmp.eq.s32.totalorder %s1938_s26, 0 }
  0x29   : > { %s2531_s19 = smov (%p51_p7, %s49_s19), 0  ;;  %p71_p10 = scmp.ne.s32.totalorder %s1922_s22, %s1918_s21 }
  0x2a   : > { %2515 = sst [smem:[#allocation23_spill]] %s2531_s19  ;;  %s53_s1 = ssub.s32 %s1934_s25, %s2531_s19 }
  0x2b   : > { %p265_p11 = scmp.eq.s32.totalorder %s2050_s27, 1  ;;  %p56_p12 = scmp.eq.s32.totalorder %s53_s1, 0 }
  0x2c   : > { %p2103_p13 = por %p72_p1, %p71_p10  ;;  %p271_p2 = scmp.eq.s32.totalorder %s2500_s28, 1 }
  0x2d   : > { %p2107_p0 = por %p265_p11, %p65_p8  ;;  %p67_p5 = por %p66_p9, %p65_p8 }
  0x2e   : > { %s2114_s12 = scalar_select %p56_p12, %s1926_s23, %s58_s18  }
  0x2f   : > { %p2116_p6 = por %p271_p2, %p71_p10  ;;  %s441_s30 = sand.u32 1, %s1926_s23  }
  0x30   : > { %s1394_s15 = sshll.u32 %s1934_s25, 3  ;;  %p1514_p7 = scmp.lt.s32.totalorder %s1938_s26, 2 }
  0x31   : > { %s1393_s20 = sshll.u32 %s441_s30, 3  ;;  %s2519_s0 = sld [smem:[#allocation24_spill]] }
  0x32   : > { %s445_s5 = scalar_lea.vmem [#allocation2], %s1393_s20  ;;  %p1494_p11 = pnand %p1514_p7, %p67_p5 }
  0x33   : > { %s454_s19 = sshll.u32 %s445_s5, 4  ;;  %s442_s18 = scalar_lea.sflag [#allocation3], %s441_s30  ;;  %s455_s19 = int_to_ptr.vmem [resolvable:$true] %s454_s19 }
  0x34   : > { %s2129_s28 = sand.u32 (!%p2058_p3), 1, %s1922_s22  }
  0x35   : > { %463 = sbr.rel (%p2058_p3) target bundleno = 655 (0x28f), region = 56  ;;  %s1396_s29 = sshll.u32 (!%p2058_p3), %s2129_s28, 3 }
  0x36   : > { %s469_s20 = scalar_lea.vmem (!%p2058_p3), [#allocation2], %s1396_s29 }
  0x37   : > { %s450_s1 = scalar_lea.hbm %s2519_s0, %s1394_s15  ;;  %s466_s15 = scalar_lea.sflag (!%p2058_p3), [#allocation3], %s2129_s28 }
  0x38   : > { %s452_s4 = sshll.u32 %s450_s1, 4  ;;  %s453_s4 = int_to_ptr.hbm [resolvable:$true] %s452_s4 }
  0x39   : > { %1496 = dma.hbm_to_vmem [thread:$0]  (!%p1494_p11), %s453_s4, 128, %s455_s19, %s442_s18  }
  0x3a   : > { %1893 = dma.done.wait (%p2103_p13), %s466_s15, 128  }
  0x3b   : > { %1895 = vsyncadd (%p2103_p13), %s466_s15, 4294967168 }
  0x3c   : > { %1897 = dma.done.wait (%p72_p1), [#allocation6], 272  }
  0x3d   : > { %1899 = vsyncadd (%p72_p1), [#allocation6], 4294967024 }
  0x3e   : > { %1901 = dma.done.wait (%p72_p1), [#allocation9], 512  }
  0x3f   : > { %1903 = vsyncadd (%p72_p1), [#allocation9], 4294966784  ;;  %vm550_vm0 = vcmask 261120   ;;  %v547_v0 = vld [vmem:[%s469_s20] sm:$0xff]  ;;  %v1946_v2 = vmov 32.0   ;;  %v1445_v17 = vld [vmem:[#allocation7] sm:$0xff] }
  0x40   : > { %v551_v1 = vsel %vm550_vm0, %v547_v0, 0.0  ;;  %1602 = vrcp.f32 %v1946_v2  ;;  %v1446_v14 = vld [vmem:[#allocation7 + $0x8] sm:$0xff]  ;;  %v1448_v15 = vld [vmem:[#allocation8 + $0x8] sm:$0xff]  ;;  %v1447_v18 = vld [vmem:[#allocation8] sm:$0xff]  ;;  %s2520_s2 = sld [smem:[#allocation26_spill]]  ;;  %s2154_s13 = scalar_lea.vmem [#allocation11], %s1396_s29 }
  0x41   : > { %552 = vadd.xlane.f32.xlu0 %v551_v1  ;;  %v1450_v16 = vld [vmem:[#allocation10 + $0x8] sm:$0xff]  ;;  %619 = vmatpush.bf16.msra.mxu0 %v1446_v14  ;;  %v1449_v19 = vld [vmem:[#allocation10] sm:$0xff]  ;;  %v1597_v29 = vld [vmem:[#allocation5] ss:$0 sm:$0xff]  ;;  %s2521_s6 = sld [smem:[#allocation30_spill]]  ;;  %s1947_s29 = smov 120  }
  0x42   : > { %653 = vmatpush.bf16.msra.mxu1 %v1448_v15  ;;  %686 = vmatpush.bf16.msra.mxu2 %v1450_v16  ;;  %v1600_v37 = vld [vmem:[%s2492_s7] ss:$0 sm:$0xff]  ;;  %s1948_s15 = smov 112   ;;  %s1949_s20 = smov 104  }
  0x43   : > { %v1601_v43 = vld [vmem:[%s2493_s8] ss:$0 sm:$0xff]  ;;  %s1436_s4 = sshll.u32 %s1930_s24, 3  ;;  %s1108_s30 = sshll.u32 %s2154_s13, 4  ;;  %s1109_s30 = int_to_ptr.vmem [resolvable:$true] %s1108_s30 }
  0x44   : > { %s1106_s16 = scalar_lea.hbm %s2494_s9, %s1436_s4  ;;  %s1080_s1 = scalar_lea.sflag [#allocation4], %s2129_s28 }
  0x45   : > { %620 = vmatpush.bf16.msra.mxu0 %v1445_v17  ;;  %s1110_s14 = sshll.u32 %s1106_s16, 4  ;;  %s1111_s14 = int_to_ptr.hbm [resolvable:$true] %s1110_s14 }
  0x46   : > { %v1603_v3 = vpop.eup %1602  ;;  %654 = vmatpush.bf16.msra.mxu1 %v1447_v18  ;;  %687 = vmatpush.bf16.msra.mxu2 %v1449_v19  ;;  %v1598_v32 = vld [vmem:[%s2520_s2] ss:$0 sm:$0xff]  ;;  %s1770_s18 = sshra.s32 %s1111_s14, 4  ;;  %s1771_s18 = int_to_ptr.hbm [resolvable:$true] %s1770_s18 }
  0x47   : > { %v555_v4 = vmul.f32 32.0, %v1603_v3  ;;  %vm559_vm1 = vweird.f32 %v1603_v3  ;;  %v1599_v36 = vld [vmem:[%s2521_s6] ss:$0 sm:$0xff]  ;;  %p1777_p9 = scmp.lt.s32.totalorder %s1771_s18, %s2494_s9 }
  0x49   : > { %v556_v5 = vsub.f32 1.0, %v555_v4 }
  0x4b   : > { %v557_v6 = vmul.f32 %v1603_v3, %v556_v5 }
  0x4d   : > { %v558_v7 = vadd.f32 %v1603_v3, %v557_v6 }
  0x4f   : > { %v560_v8 = vsel %vm559_vm1, %v1603_v3, %v558_v7 }
  0xb4   : > { %v553_v9 = vpop.xlane.xlu0 %552 }
  0xb5   : > { %v561_v10 = vmul.f32 %v560_v8, %v553_v9 }
  0xb7   : > { %v562_v11 = vsub.f32 %v547_v0, %v561_v10 }
  0xb9   : > { %v563_v12 = vmul.f32 %v562_v11, %v562_v11 }
  0xbb   : > { %v564_v13 = vsel %vm550_vm0, %v563_v12, 0.0 }
  0xbc   : > { %565 = vadd.xlane.f32.xlu0 %v564_v13 }
 0x12f   : > { %v566_v20 = vpop.xlane.xlu0 %565 }
 0x130   : > { %v567_v21 = vmul.f32 %v566_v20, %v560_v8 }
 0x132   : > { %v568_v22 = vadd.f32 1e-12, %v567_v21 }
 0x134   : > { %1604 = vrsqrt.f32 %v568_v22  ;;  %vm575_vm3 = vweird.f32 %v568_v22 }
 0x13a   : > { %v1605_v23 = vpop.eup %1604 }
 0x13b   : > { %v570_v24 = vmul.f32 %v1605_v23, %v568_v22  ;;  %vm576_vm2 = vweird.f32 %v1605_v23 }
 0x13c   : > { %vm577_vm4 = vmor %vm575_vm3, %vm576_vm2 }
 0x13d   : > { %v571_v25 = vmul.f32 %v1605_v23, %v570_v24 }
 0x13f   : > { %v572_v26 = vmul.f32 0.5, %v571_v25 }
 0x141   : > { %v573_v27 = vsub.f32 1.5, %v572_v26 }
 0x143   : > { %v574_v28 = vmul.f32 %v1605_v23, %v573_v27 }
 0x145   : > { %v578_v30 = vsel %vm577_vm4, %v1605_v23, %v574_v28 }
 0x146   : > { %v579_v31 = vmul.f32 %v578_v30, %v562_v11 }
 0x148   : > { %v583_v33 = vmul.f32 %v1597_v29, %v579_v31 }
 0x14a   : > { %v587_v34 = vadd.f32 %v1598_v32, %v583_v33 }
 0x14c   : > { %v589_v35 = vpack.c.bf16 %v587_v34, %v587_v34  ;;  %588 = vst.msk [vmem:[%s2154_s13] sm:$0xff] %vm550_vm0, %v587_v34 }
 0x14e   : > { %1413 = vmatmul.msk.bf16.vlgmr.msra.gmra.mxu0 %vm550_vm0, %v589_v35  ;;  %1422 = vmatmul.msk.bf16.vlgmr.msra.gmra.mxu1 %vm550_vm0, %v589_v35 }
 0x14f   : > { %1431 = vmatmul.msk.bf16.vlgmr.msra.gmra.mxu2 %vm550_vm0, %v589_v35 }
 0x1cb   : > { %v622_v38 = vpop.f32.mrf.mxu0  ;;  %v656_v39 = vpop.f32.mrf.mxu1 }
 0x1cc   : > { %v623_v40 = vadd.f32 %v1599_v36, %v622_v38  ;;  %v2169_v42 = vadd.f32 %v1600_v37, %v656_v39 }
 0x1ce   : > { %v2167_v41 = vmul.f32 0.35355338, %v623_v40 }
 0x1d0   : > { %v1587_v44 = vpack.i.bf16 %v2169_v42, %v2167_v41 }
 0x1d2   : > { %v689_v45 = vpop.f32.mrf.mxu2  ;;  %1588 = vrot.lane.b32.xlu2 %v1587_v44, %s1947_s29  ;;  %1583 = vrot.lane.b32.xlu1 %v1587_v44, %s1948_s15 }
 0x1d3   : > { %v2176_v46 = vadd.f32 %v1601_v43, %v689_v45  ;;  %v624_v47 = vpop.f32.mrf.mxu0  ;;  %v658_v48 = vpop.f32.mrf.mxu1 }
 0x1d5   : > { %952 = vrot.lane.b32.xlu0 %v2176_v46, %s1947_s29  ;;  %s1772_s29 = scalar_lea.hbm %s1771_s18, 8 }
 0x1d6   : > { %p1773_p1 = scmp.ne.s32.totalorder %s1771_s18, %s1772_s29 }
 0x1d8   : > { %p1774_p3 = pnand %p1773_p1, %p2107_p0 }
 0x1da   : > { %v691_v49 = vpop.f32.mrf.mxu2  ;;  %1593 = vrot.lane.b32.xlu2 %v1587_v44, %s1949_s20  ;;  %955 = vrot.lane.b32.xlu1 %v2176_v46, %s1948_s15  ;;  %p1775_p8 = pneg %p1774_p3 }
 0x1e2   : > { %958 = vrot.lane.b32.xlu1 %v2176_v46, %s1949_s20  ;;  %s1776_s20 = scalar_lea.hbm %s2494_s9, 16 }
 0x1e3   : > { %p1778_p10 = scmp.lt.s32.totalorder %s1776_s20, %s1772_s29 }
 0x1e5   : > { %p1779_p12 = por %p1778_p10, %p1777_p9 }
 0x1e7   : > { %p1780_p13 = pnand %p1779_p12, %p1775_p8 }
 0x1e9   : > { %1783 = shalt.err (!%p1780_p13)
}
 0x1ea   : > { %1472 = dma.vmem_to_hbm [thread:$0]  (%p2107_p0), %s1109_s30, 128, %s1111_s14, %s1080_s1   ;;  %v1950_v56 = vmov 1983009808   ;;  %vm704_vm5 = vcmask 1047556   ;;  %v1951_v3 = vmov 1934713408  }
 0x1eb   : > { %v709_v57 = vunpack.c.l.s4 %v1950_v56  ;;  %v733_v4 = vunpack.c.l.s4 %v1951_v3  ;;  %v835_v7 = vrot.slane %v2169_v42, 4  ;;  %v706_v9 = vrot.slane %v2167_v41, 4  ;;  %s2285_s0 = sshll.u32 %s1930_s24, 4  ;;  %s2290_s2 = sshll.u32 %s2129_s28, 4 }
 0x1ec   : > { %s1122_s13 = scalar_lea.hbm %s2495_s10, %s2285_s0  ;;  %s1084_s4 = sand.u32 1, %s2050_s27   ;;  %vm818_vm6 = vcmask 60416  }
 0x1ed   : > { %v2197_v62 = vunpack.c.0.s8 %v709_v57  ;;  %v2209_v14 = vunpack.c.0.s8 %v733_v4  ;;  %s2314_s5 = scalar_lea.vmem [#allocation12], %s2290_s2  ;;  %s2318_s16 = sshll.u32 %s1122_s13, 4  ;;  %s1126_s16 = int_to_ptr.hbm [resolvable:$true] %s2318_s16 }
 0x1ee   : > { %s1123_s19 = sshll.u32 %s2314_s5, 4  ;;  %s1140_s1 = scalar_lea.hbm %s2496_s11, %s2285_s0  ;;  %s2324_s19 = int_to_ptr.vmem [resolvable:$true] %s1123_s19 }
 0x1ef   : > { %s2354_s18 = sshll.u32 %s1140_s1, 4  ;;  %s2357_s29 = scalar_lea.vmem [#allocation14], %s2290_s2  ;;  %s1144_s18 = int_to_ptr.hbm [resolvable:$true] %s2354_s18 }
 0x1f0   : > { %s1141_s15 = sshll.u32 %s2357_s29, 4  ;;  %s2363_s20 = scalar_lea.sflag [#allocation13], %s1084_s4  ;;  %s2393_s15 = int_to_ptr.vmem [resolvable:$true] %s1141_s15 }
 0x1f1   : > { %s1798_s6 = sshra.s32 %s1126_s16, 4  ;;  %s1804_s30 = scalar_lea.hbm %s2495_s10, 32  ;;  %s1799_s6 = int_to_ptr.hbm [resolvable:$true] %s1798_s6 }
 0x1f2   : > { %s1800_s24 = scalar_lea.hbm %s1799_s6, 16  ;;  %p1805_p11 = scmp.lt.s32.totalorder %s1799_s6, %s2495_s10 }
 0x1f3   : > { %p1801_p2 = scmp.ne.s32.totalorder %s1799_s6, %s1800_s24  ;;  %p1806_p1 = scmp.lt.s32.totalorder %s1804_s30, %s1800_s24 }
 0x1f5   : > { %p1802_p5 = pnand %p1801_p2, %p2107_p0  ;;  %p1807_p3 = por %p1806_p1, %p1805_p11 }
 0x1f7   : > { %p1803_p7 = pneg %p1802_p5 }
 0x1f9   : > { %p1808_p8 = pnand %p1807_p3, %p1803_p7 }
 0x22c   : > { %v1589_v50 = vpop.permute.xlu2 %1588 }
 0x22d   : > { %v1591_v54 = vunpack.i.h.bf16 %v1589_v50  ;;  %v1590_v55 = vunpack.i.l.bf16 %v1589_v50 }
 0x22f   : > { %v847_v60 = vrot.slane %v1591_v54, 4  ;;  %v718_v61 = vrot.slane %v1590_v55, 4 }
 0x234   : > { %v1594_v51 = vpop.permute.xlu2 %1593 }
 0x235   : > { %v1596_v52 = vunpack.i.h.bf16 %v1594_v51  ;;  %v1595_v53 = vunpack.i.l.bf16 %v1594_v51 }
 0x237   : > { %v845_v58 = vrot.slane %v1596_v52, 4  ;;  %v716_v59 = vrot.slane %v1595_v53, 4  ;;  %v719_v63 = vsel %vm704_vm5, %v1595_v53, %v718_v61  ;;  %v848_v0 = vsel %vm704_vm5, %v1596_v52, %v847_v60 }
 0x238   : > { %v727_v5 = vperm.slane %v719_v63, %v2197_v62  ;;  %v856_v6 = vperm.slane %v848_v0, %v2197_v62 }
 0x239   : > { %v717_v1 = vsel %vm704_vm5, %v716_v59, %v1590_v55  ;;  %v846_v2 = vsel %vm704_vm5, %v845_v58, %v1591_v54 }
 0x23a   : > { %v723_v10 = vperm.slane %v717_v1, %v2197_v62  ;;  %v852_v11 = vperm.slane %v846_v2, %v2197_v62  ;;  %v740_v19 = vrot.slane %v727_v5, 4  ;;  %v869_v20 = vrot.slane %v856_v6, 4 }
 0x23c   : > { %v728_v23 = vrot.slane %v723_v10, 4  ;;  %v857_v24 = vrot.slane %v852_v11, 4 }
 0x244   : > { %v1584_v8 = vpop.permute.xlu1 %1583 }
 0x245   : > { %v1586_v12 = vunpack.i.h.bf16 %v1584_v8  ;;  %v1585_v13 = vunpack.i.l.bf16 %v1584_v8 }
 0x247   : > { %v833_v15 = vrot.slane %v1586_v12, 4  ;;  %v836_v16 = vsel %vm704_vm5, %v1586_v12, %v835_v7  ;;  %v703_v17 = vrot.slane %v1585_v13, 4  ;;  %v707_v18 = vsel %vm704_vm5, %v1585_v13, %v706_v9 }
 0x248   : > { %v844_v21 = vperm.slane %v836_v16, %v2197_v62  ;;  %v715_v22 = vperm.slane %v707_v18, %v2197_v62 }
 0x249   : > { %v834_v25 = vsel %vm704_vm5, %v833_v15, %v2169_v42  ;;  %v705_v26 = vsel %vm704_vm5, %v703_v17, %v2167_v41 }
 0x24a   : > { %v840_v27 = vperm.slane %v834_v25, %v2197_v62  ;;  %v870_v28 = vsel %vm704_vm5, %v869_v20, %v844_v21  ;;  %v871_v29 = vrot.slane %v844_v21, 4  ;;  %v711_v30 = vperm.slane %v705_v26, %v2197_v62 }
 0x24b   : > { %v876_v31 = vperm.slane %v870_v28, %v2209_v14  ;;  %v741_v32 = vsel %vm704_vm5, %v740_v19, %v715_v22  ;;  %v742_v33 = vrot.slane %v715_v22, 4 }
 0x24c   : > { %v858_v34 = vsel %vm704_vm5, %v857_v24, %v840_v27  ;;  %v859_v35 = vrot.slane %v840_v27, 4  ;;  %v872_v36 = vsel %vm704_vm5, %v856_v6, %v871_v29  ;;  %v729_v37 = vsel %vm704_vm5, %v728_v23, %v711_v30  ;;  %v956_v16 = vpop.permute.xlu1 %955 }
 0x24d   : > { %v864_v38 = vperm.slane %v858_v34, %v2209_v14  ;;  %v880_v39 = vperm.slane %v872_v36, %v2209_v14  ;;  %v885_v40 = vrot.slane %v876_v31, 4  ;;  %v730_v41 = vrot.slane %v711_v30, 4 }
 0x24e   : > { %v860_v42 = vsel %vm704_vm5, %v852_v11, %v859_v35  ;;  %v735_v43 = vperm.slane %v729_v37, %v2209_v14  ;;  %v743_v44 = vsel %vm704_vm5, %v727_v5, %v742_v33  ;;  %v747_v45 = vperm.slane %v741_v32, %v2209_v14  ;;  %v953_v37 = vpop.permute.xlu0 %952 }
 0x24f   : > { %v868_v47 = vperm.slane %v860_v42, %v2209_v14  ;;  %v881_v48 = vrot.slane %v864_v38, 4  ;;  %v887_v49 = vrot.slane %v880_v39, 4  ;;  %v886_v50 = vsel %vm704_vm5, 0.0, %v885_v40 }
 0x250   : > { %v731_v51 = vsel %vm704_vm5, %v723_v10, %v730_v41  ;;  %v751_v52 = vperm.slane %v743_v44, %v2209_v14  ;;  %v752_v53 = vrot.slane %v735_v43, 4  ;;  %v756_v57 = vrot.slane %v747_v45, 4 }
 0x251   : > { %v883_v54 = vrot.slane %v868_v47, 4  ;;  %v888_v55 = vsel %vm704_vm5, 0.0, %v887_v49  ;;  %v900_v56 = vsel %vm704_vm5, %v887_v49, %v876_v31  ;;  %v882_v58 = vsel %vm704_vm5, 0.0, %v881_v48 }
 0x252   : > { %v904_v59 = vperm.slane %v900_v56, %v2197_v62  ;;  %v905_v60 = vrot.slane %v888_v55, 4  ;;  %v739_v61 = vperm.slane %v731_v51, %v2209_v14  ;;  %v753_v1 = vsel %vm704_vm5, 0.0, %v752_v53 }
 0x253   : > { %v884_v63 = vsel %vm704_vm5, 0.0, %v883_v54  ;;  %v889_v0 = vsel %vm704_vm5, %v883_v54, %v864_v38  ;;  %v758_v2 = vrot.slane %v751_v52, 4  ;;  %v757_v9 = vsel %vm704_vm5, 0.0, %v756_v57 }
 0x254   : > { %v893_v3 = vperm.slane %v889_v0, %v2197_v62  ;;  %v894_v4 = vrot.slane %v884_v63, 4  ;;  %v906_v5 = vsel %vm704_vm5, %v905_v60, %v886_v50  ;;  %v925_v6 = vrot.slane %v904_v59, 4  ;;  %v959_v56 = vpop.permute.xlu1 %958 }
 0x255   : > { %v910_v7 = vperm.slane %v906_v5, %v2197_v62  ;;  %v754_v8 = vrot.slane %v739_v61, 4  ;;  %v759_v10 = vsel %vm704_vm5, 0.0, %v758_v2  ;;  %v771_v13 = vsel %vm704_vm5, %v758_v2, %v747_v45 }
 0x256   : > { %v895_v11 = vsel %vm704_vm5, %v894_v4, %v882_v58  ;;  %v913_v12 = vrot.slane %v893_v3, 4  ;;  %v776_v15 = vrot.slane %v759_v10, 4  ;;  %v775_v39 = vperm.slane %v771_v13, %v2197_v62 }
 0x257   : > { %v899_v17 = vperm.slane %v895_v11, %v2197_v62  ;;  %v923_v18 = vrot.slane %v910_v7, 4  ;;  %v926_v19 = vsel %vm704_vm5, %v910_v7, %v925_v6  ;;  %v755_v20 = vsel %vm704_vm5, 0.0, %v754_v8 }
 0x258   : > { %v2256_v21 = vperm.slane %v926_v19, %v2209_v14  ;;  %v760_v22 = vsel %vm704_vm5, %v754_v8, %v735_v43  ;;  %v765_v23 = vrot.slane %v755_v20, 4  ;;  %v777_v24 = vsel %vm704_vm5, %v776_v15, %v757_v9 }
 0x259   : > { %v911_v25 = vrot.slane %v899_v17, 4  ;;  %v914_v26 = vsel %vm704_vm5, %v899_v17, %v913_v12  ;;  %v924_v27 = vsel %vm704_vm5, %v923_v18, %v904_v59  ;;  %v764_v28 = vperm.slane %v760_v22, %v2197_v62 }
 0x25a   : > { %v2264_v29 = vperm.slane %v914_v26, %v2209_v14  ;;  %v930_v30 = vperm.slane %v924_v27, %v2209_v14  ;;  %v939_v31 = vrot.slane %v2256_v21, 4  ;;  %v766_v32 = vsel %vm704_vm5, %v765_v23, %v753_v1 }
 0x25b   : > { %v912_v33 = vsel %vm704_vm5, %v911_v25, %v893_v3  ;;  %v770_v34 = vperm.slane %v766_v32, %v2197_v62  ;;  %v781_v35 = vperm.slane %v777_v24, %v2197_v62  ;;  %v784_v36 = vrot.slane %v764_v28, 4 }
 0x25c   : > { %v918_v38 = vperm.slane %v912_v33, %v2209_v14  ;;  %v935_v40 = vrot.slane %v930_v30, 4  ;;  %v975_v45 = vrot.slane %v953_v37, 4  ;;  %v963_v47 = vrot.slane %v2176_v46, 4 }
 0x25d   : > { %v782_v41 = vrot.slane %v770_v34, 4  ;;  %v785_v42 = vsel %vm704_vm5, %v770_v34, %v784_v36  ;;  %v794_v43 = vrot.slane %v781_v35, 4  ;;  %v2279_v48 = vsel %vm704_vm5, %v939_v31, %v2264_v29 }
 0x25e   : > { %v793_v44 = vperm.slane %v785_v42, %v2209_v14  ;;  %v941_v49 = vrot.slane %v2264_v29, 4  ;;  %v937_v52 = vrot.slane %v918_v38, 4  ;;  %v796_v54 = vrot.slane %v775_v39, 4 }
 0x25f   : > { %v783_v50 = vsel %vm704_vm5, %v782_v41, %v764_v28  ;;  %v795_v51 = vsel %vm704_vm5, %v794_v43, %v775_v39  ;;  %v2293_v57 = vsel %vm704_vm5, %v935_v40, %v918_v38  ;;  %v961_v59 = vrot.slane %v956_v16, 4 }
 0x260   : > { %v789_v53 = vperm.slane %v783_v50, %v2209_v14  ;;  %v801_v55 = vperm.slane %v795_v51, %v2209_v14  ;;  %v812_v58 = vrot.slane %v793_v44, 4  ;;  %v964_v60 = vsel %vm704_vm5, %v956_v16, %v963_v47 }
 0x261   : > { %v797_v61 = vsel %vm704_vm5, %v781_v35, %v796_v54  ;;  %v972_v1 = vperm.slane %v964_v60, %v2197_v62  ;;  %v962_v3 = vsel %vm704_vm5, %v961_v59, %v2176_v46  ;;  %v973_v4 = vrot.slane %v959_v56, 4 }
 0x262   : > { %v806_v63 = vrot.slane %v801_v55, 4  ;;  %v808_v0 = vrot.slane %v789_v53, 4  ;;  %v805_v2 = vperm.slane %v797_v61, %v2209_v14  ;;  %v976_v5 = vsel %vm704_vm5, %v959_v56, %v975_v45 }
 0x263   : > { %v2307_v6 = vsel %vm704_vm5, %v930_v30, %v937_v52  ;;  %v968_v9 = vperm.slane %v962_v3, %v2197_v62  ;;  %v999_v15 = vrot.slane %v972_v1, 4  ;;  %v974_v16 = vsel %vm704_vm5, %v973_v4, %v953_v37 }
 0x264   : > { %v807_v7 = vsel %vm704_vm5, %v806_v63, %v789_v53  ;;  %v809_v8 = vsel %vm704_vm5, %v801_v55, %v808_v0  ;;  %v810_v10 = vrot.slane %v805_v2, 4  ;;  %v813_v46 = vsel %vm704_vm5, %v805_v2, %v812_v58 }
 0x265   : > { %v814_v11 = vpack.c.bf16 %v807_v7, %v807_v7  ;;  %v815_v12 = vpack.c.bf16 %v809_v8, %v809_v8  ;;  %v817_v13 = vpack.c.bf16 %v813_v46, %v813_v46  ;;  %v984_v17 = vperm.slane %v976_v5, %v2197_v62 }
 0x266   : > { %v811_v18 = vsel %vm704_vm5, %v810_v10, %v793_v44  ;;  %v987_v19 = vrot.slane %v968_v9, 4  ;;  %v980_v20 = vperm.slane %v974_v16, %v2197_v62  ;;  %v942_v22 = vsel %vm704_vm5, %v2256_v21, %v941_v49 }
 0x267   : > { %v816_v23 = vpack.c.bf16 %v811_v18, %v811_v18  ;;  %v997_v24 = vrot.slane %v984_v17, 4  ;;  %v1000_v25 = vsel %vm704_vm5, %v984_v17, %v999_v15  ;;  %819 = vst.msk [vmem:[%s2314_s5] sm:$0xf] %vm818_vm6, %v814_v11  ;;  %v943_v26 = vpack.c.bf16 %v2293_v57, %v2293_v57 }
 0x268   : > { %v985_v27 = vrot.slane %v980_v20, 4  ;;  %v988_v28 = vsel %vm704_vm5, %v980_v20, %v987_v19  ;;  %v1008_v21 = vperm.slane %v1000_v25, %v2209_v14  ;;  %820 = vst.msk [vmem:[%s2314_s5 + $0x4] sm:$0xf] %vm818_vm6, %v815_v12  ;;  %v944_v29 = vpack.c.bf16 %v2307_v6, %v2307_v6 }
 0x269   : > { %v996_v30 = vperm.slane %v988_v28, %v2209_v14  ;;  %v998_v31 = vsel %vm704_vm5, %v997_v24, %v972_v1  ;;  %821 = vst.msk [vmem:[%s2314_s5 + $0x8] sm:$0xf] %vm818_vm6, %v816_v23  ;;  %v945_v32 = vpack.c.bf16 %v2279_v48, %v2279_v48  ;;  %v946_v36 = vpack.c.bf16 %v942_v22, %v942_v22 }
 0x26a   : > { %v986_v33 = vsel %vm704_vm5, %v985_v27, %v968_v9  ;;  %v1004_v34 = vperm.slane %v998_v31, %v2209_v14  ;;  %v1015_v35 = vrot.slane %v1008_v21, 4  ;;  %822 = vst.msk [vmem:[%s2314_s5 + $0xc] sm:$0xf] %vm818_vm6, %v817_v13 }
 0x26b   : > { %v992_v37 = vperm.slane %v986_v33, %v2209_v14  ;;  %v1011_v38 = vrot.slane %v996_v30, 4 }
 0x26c   : > { %1811 = shalt.err (!%p1808_p8)
}
 0x26d   : > { %s1952_s27 = smov 64   ;;  %s1953_s4 = smov 4   ;;  %v1013_v39 = vrot.slane %v1004_v34, 4  ;;  %v1016_v40 = vsel %vm704_vm5, 0.0, %v1015_v35  ;;  %v1028_v41 = vsel %vm704_vm5, %v1015_v35, %v1004_v34  ;;  %947 = vst.msk [vmem:[%s2357_s29] sm:$0xf] %vm818_vm6, %v943_v26  ;;  %v1017_v44 = vsel %vm704_vm5, %v1011_v38, %v992_v37 }
 0x26e   : > { %1473 = dma.vmem_to_hbm [thread:$0]  (%p2107_p0), %s2324_s19, 256, %s1126_s16, %s2363_s20, %s1952_s27, %s1952_s27, %s1953_s4   ;;  %v1009_v42 = vrot.slane %v992_v37, 4  ;;  %v1012_v43 = vsel %vm704_vm5, 0.0, %v1011_v38  ;;  %v1032_v45 = vperm.slane %v1028_v41, %v2197_v62  ;;  %v1021_v48 = vperm.slane %v1017_v44, %v2197_v62 }
 0x26f   : > { %948 = vst.msk [vmem:[%s2357_s29 + $0x4] sm:$0xf] %vm818_vm6, %v944_v29  ;;  %v1014_v47 = vsel %vm704_vm5, 0.0, %v1013_v39  ;;  %v1022_v49 = vrot.slane %v1012_v43, 4  ;;  %v1033_v50 = vrot.slane %v1016_v40, 4  ;;  %s1826_s19 = sshra.s32 %s1144_s18, 4  ;;  %s1827_s19 = int_to_ptr.hbm [resolvable:$true] %s1826_s19 }
 0x270   : > { %949 = vst.msk [vmem:[%s2357_s29 + $0x8] sm:$0xf] %vm818_vm6, %v945_v32  ;;  %v1010_v51 = vsel %vm704_vm5, 0.0, %v1009_v42  ;;  %v1053_v52 = vrot.slane %v1032_v45, 4  ;;  %v1041_v55 = vrot.slane %v1021_v48, 4  ;;  %s1828_s16 = scalar_lea.hbm %s1827_s19, 16  ;;  %p1833_p13 = scmp.lt.s32.totalorder %s1827_s19, %s2496_s11 }
 0x271   : > { %950 = vst.msk [vmem:[%s2357_s29 + $0xc] sm:$0xf] %vm818_vm6, %v946_v36  ;;  %v1023_v53 = vsel %vm704_vm5, %v1022_v49, %v1010_v51  ;;  %v1034_v54 = vsel %vm704_vm5, %v1033_v50, %v1014_v47  ;;  %p1829_p9 = scmp.ne.s32.totalorder %s1827_s19, %s1828_s16  ;;  %s1832_s13 = scalar_lea.hbm %s2496_s11, 32 }
 0x272   : > { %p1834_p2 = scmp.lt.s32.totalorder %s1832_s13, %s1828_s16 }
 0x273   : > { %p1830_p10 = pnand %p1829_p9, %p2107_p0 }
 0x274   : > { %p1835_p5 = por %p1834_p2, %p1833_p13 }
 0x275   : > { %p1831_p12 = pneg %p1830_p10 }
 0x277   : > { %p1836_p7 = pnand %p1835_p5, %p1831_p12 }
 0x279   : > { %1839 = shalt.err (!%p1836_p7)
}
 0x27a   : > { %1474 = dma.vmem_to_hbm [thread:$0]  (%p2107_p0), %s2393_s15, 256, %s1144_s18, %s2363_s20, %s1952_s27, %s1952_s27, %s1953_s4   ;;  %v1027_v56 = vperm.slane %v1023_v53, %v2197_v62  ;;  %v1038_v57 = vperm.slane %v1034_v54, %v2197_v62 }
 0x27b   : > { %s2522_s15 = sld [smem:[#allocation31_spill]]  ;;  %s545_s14 = scalar_lea.vmem [#allocation15], %s2290_s2 }
 0x27c   : > { %v1039_v58 = vrot.slane %v1027_v56, 4  ;;  %v1042_v59 = vsel %vm704_vm5, %v1027_v56, %v1041_v55  ;;  %v1051_v60 = vrot.slane %v1038_v57, 4  ;;  %v1054_v61 = vsel %vm704_vm5, %v1038_v57, %v1053_v52  ;;  %s1159_s1 = sshll.u32 %s545_s14, 4  ;;  %s1160_s1 = int_to_ptr.vmem [resolvable:$true] %s1159_s1 }
 0x27d   : > { %v1050_v63 = vperm.slane %v1042_v59, %v2209_v14  ;;  %v1062_v0 = vperm.slane %v1054_v61, %v2209_v14 }
 0x27e   : > { %v1040_v1 = vsel %vm704_vm5, %v1039_v58, %v1021_v48  ;;  %v1052_v2 = vsel %vm704_vm5, %v1051_v60, %v1032_v45 }
 0x27f   : > { %v1046_v3 = vperm.slane %v1040_v1, %v2209_v14  ;;  %v1058_v4 = vperm.slane %v1052_v2, %v2209_v14  ;;  %v1067_v62 = vrot.slane %v1062_v0, 4  ;;  %v1069_v5 = vrot.slane %v1050_v63, 4 }
 0x281   : > { %s1158_s20 = scalar_lea.hbm %s2522_s15, %s2285_s0  ;;  %v1063_v6 = vrot.slane %v1058_v4, 4  ;;  %v1065_v7 = vrot.slane %v1046_v3, 4  ;;  %v1068_v8 = vsel %vm704_vm5, %v1067_v62, %v1050_v63  ;;  %v1070_v9 = vsel %vm704_vm5, %v1062_v0, %v1069_v5  ;;  %s1095_s0 = scalar_lea.sflag [#allocation16], %s2129_s28 }
 0x282   : > { %v1073_v10 = vpack.c.bf16 %v1068_v8, %v1068_v8  ;;  %v1074_v46 = vpack.c.bf16 %v1070_v9, %v1070_v9  ;;  %s2437_s19 = sshll.u32 %s1158_s20, 4  ;;  %s1860_s13 = scalar_lea.hbm %s2522_s15, 32  ;;  %s1162_s19 = int_to_ptr.hbm [resolvable:$true] %s2437_s19 }
 0x283   : > { %v1064_v14 = vsel %vm704_vm5, %v1063_v6, %v1046_v3  ;;  %v1066_v11 = vsel %vm704_vm5, %v1058_v4, %v1065_v7  ;;  %s1854_s2 = sshra.s32 %s1162_s19, 4  ;;  %s1855_s2 = int_to_ptr.hbm [resolvable:$true] %s1854_s2 }
 0x284   : > { %v1071_v12 = vpack.c.bf16 %v1064_v14, %v1064_v14  ;;  %v1072_v13 = vpack.c.bf16 %v1066_v11, %v1066_v11  ;;  %1077 = vst.msk [vmem:[%s545_s14 + $0x8] sm:$0xf] %vm818_vm6, %v1073_v10  ;;  %s1856_s16 = scalar_lea.hbm %s1855_s2, 16  ;;  %p1861_p8 = scmp.lt.s32.totalorder %s1855_s2, %s2522_s15 }
 0x285   : > { %1078 = vst.msk [vmem:[%s545_s14 + $0xc] sm:$0xf] %vm818_vm6, %v1074_v46  ;;  %p1857_p11 = scmp.ne.s32.totalorder %s1855_s2, %s1856_s16  ;;  %p1862_p9 = scmp.lt.s32.totalorder %s1860_s13, %s1856_s16 }
 0x286   : > { %1075 = vst.msk [vmem:[%s545_s14] sm:$0xf] %vm818_vm6, %v1071_v12 }
 0x287   : > { %1076 = vst.msk [vmem:[%s545_s14 + $0x4] sm:$0xf] %vm818_vm6, %v1072_v13  ;;  %p1858_p1 = pnand %p1857_p11, %p2107_p0  ;;  %p1863_p10 = por %p1862_p9, %p1861_p8 }
 0x289   : > { %p1859_p3 = pneg %p1858_p1 }
 0x28b   : > { %p1864_p12 = pnand %p1863_p10, %p1859_p3 }
 0x28d   : > { %1867 = shalt.err (!%p1864_p12)
}
 0x28e   : > { %1475 = dma.vmem_to_hbm [thread:$0]  (%p2107_p0), %s1160_s1, 256, %s1162_s19, %s1095_s0, %s1952_s27, %s1952_s27, %s1953_s4  }
 0x28f PF: > { %s1176_s28 = sand.u32 1, %s1918_s21   ;;  %p1498_p13 = pnand %p1392_p4, %p2116_p6 }
 0x290   : > { %s1177_s18 = scalar_lea.sflag [#allocation4], %s1176_s28 }
 0x291   : > { %p1499_p2 = pneg %p1498_p13 }
 0x293   : > { %1905 = dma.done.wait (%p1499_p2), %s1177_s18, 128  }
 0x294   : > { %1907 = vsyncadd (%p1499_p2), %s1177_s18, 4294967168  ;;  %s2523_s29 = sadd.s32 4294967294, %s1938_s26  }
 0x295   : > { %s1186_s20 = sand.u32 1, %s2523_s29  }
 0x296   : > { %s1187_s3 = scalar_lea.sflag [#allocation13], %s1186_s20 }
 0x297   : > { %1909 = dma.done.wait (%p1499_p2), %s1187_s3, 512  }
 0x298   : > { %1911 = vsyncadd (%p1499_p2), %s1187_s3, 4294966784  ;;  %s1207_s14 = scalar_lea.sflag [#allocation16], %s1176_s28 }
 0x299   : > { %1913 = dma.done.wait (%p1499_p2), %s1207_s14, 256  }
 0x29a   : > { %1915 = vsyncadd (%p1499_p2), %s1207_s14, 4294967040  ;;  %s37_s26 = sadd.s32 1, %s1938_s26   ;;  %s2524_s17 = sld [smem:[#allocation23_spill]] }
 0x29b   : > { %p34_p0 = scmp.ge.s32.totalorder %s37_s26, 4   ;;  %s2525_s21 = smov %s1922_s22 }
 0x29c   : > { %s2526_s22 = smov %s1926_s23  ;;  %s2527_s23 = smov %s2114_s12 }
 0x29d   : > { %s2528_s24 = smov %s1934_s25  ;;  %36 = sbr.rel (!%p34_p0) target bundleno = 21 (0x15), region = 166 }
 0x2a0   : > { %s2529_s25 = smov %s2524_s17 }
 0x2a2   :  { %1213 = vsyncpa [#allocation3], 1 }
 0x2a3   :  { %1215 = vsyncpa [#allocation3 + $0x1], 1 }
 0x2a4   :  { %1216 = vsyncpa [#allocation6], 1 }
 0x2a5   :  { %1217 = vsyncpa [#allocation9], 1 }
 0x2a6   :  { %1218 = vsyncpa [#allocation4], 1 }
 0x2a7   :  { %1220 = vsyncpa [#allocation4 + $0x1], 1 }
 0x2a8   :  { %1221 = vsyncpa [#allocation13], 1 }
 0x2a9   :  { %1223 = vsyncpa [#allocation13 + $0x1], 1 }
 0x2aa   :  { %1224 = vsyncpa [#allocation16], 1 }
 0x2ab   :  { %1226 = vsyncpa [#allocation16 + $0x1], 1 }

</bundles_post_ra>
